<compile_context>
chip_gen: v6e
topology: v6e:2x2x1
jax: 0.10.0
libtpu: 0.0.40
codegen_flags: <defaults>
</compile_context>

<pallas_src>
import jax
import jax.numpy as jnp
from jax.experimental import pallas as pl
from jax.experimental.pallas import tpu as pltpu


# ----------------------------------------------------------------------------
# Batch tiling helper: sublane-aligned tiles, >= 2 grid steps when possible.
# ----------------------------------------------------------------------------
def _choose_batch_tiling(batch, max_tile=1024):
    b8 = ((batch + 7) // 8) * 8                       # sublane (8) alignment
    # Prefer at least 2 grid steps once the batch allows it (keeps both v7x
    # TensorCores busy); cap the tile so double-buffered VMEM stays small.
    tb = min(max_tile, max(8, ((b8 + 15) // 16) * 8))
    bp = ((b8 + tb - 1) // tb) * tb
    return bp, tb


def _pad_batch(x2d, bp):
    b = x2d.shape[0]
    if bp == b:
        return x2d
    return jnp.pad(x2d, ((0, bp - b), (0, 0)))


# ----------------------------------------------------------------------------
# Pallas kernel 1: flat bilinear transform via Kronecker-lifted weight
#   out_b = w^T X_b w   <=>   vec(out_b) = vec(X_b) @ kron(w, w)
# ----------------------------------------------------------------------------
def _flat_matmul_kernel(x_ref, wk_ref, o_ref):
    # x_ref: (TB, n*n)  wk_ref: (n*n, m*m)  o_ref: (TB, m*m)
    o_ref[...] = jnp.dot(x_ref[...], wk_ref[...],
                         preferred_element_type=jnp.float32)


def bilinear_transform(x, w):
    """x: (B, n, n), w: (n, m) -> (B, m, m) = w^T X_b w, as one flat matmul."""
    B, n, _ = x.shape
    m = w.shape[1]
    n2, m2 = n * n, m * m

    # Kronecker lift, built once in the wrapper (no per-grid-step transposes):
    #   kron(w, w)[i*n + j, p*m + q] = w[i, p] * w[j, q]
    w_kron = jnp.kron(w, w).astype(jnp.float32)       # (n*n, m*m)

    x_flat = x.reshape(B, n2).astype(jnp.float32)
    bp, tb = _choose_batch_tiling(B)
    x_flat = _pad_batch(x_flat, bp)
    grid = bp // tb

    out_flat = pl.pallas_call(
        _flat_matmul_kernel,
        out_shape=jax.ShapeDtypeStruct((bp, m2), jnp.float32),
        grid_spec=pltpu.PrefetchScalarGridSpec(
            num_scalar_prefetch=0,
            grid=(grid,),
            in_specs=[
                pl.BlockSpec((tb, n2), lambda i: (i, 0)),
                pl.BlockSpec((n2, m2), lambda i: (0, 0)),   # grid-invariant
            ],
            out_specs=pl.BlockSpec((tb, m2), lambda i: (i, 0)),
        ),
        compiler_params=pltpu.CompilerParams(
            dimension_semantics=("parallel",)),
    )(x_flat, w_kron)

    return out_flat[:B].reshape(B, m, m)


# ----------------------------------------------------------------------------
# Pallas kernel 2: fused fully-connected layer + log_softmax (batch-tiled)
# ----------------------------------------------------------------------------
def _fc_logsoftmax_kernel(feat_ref, fcw_ref, out_ref):
    # feat_ref: (TB, F)  fcw_ref: (F, C)  out_ref: (TB, C)
    logits = jnp.dot(feat_ref[...], fcw_ref[...],
                     preferred_element_type=jnp.float32)
    mx = jnp.max(logits, axis=-1, keepdims=True)
    z = logits - mx
    lse = jnp.log(jnp.sum(jnp.exp(z), axis=-1, keepdims=True))
    out_ref[...] = z - lse


def fc_log_softmax(feat, fc_w):
    B, F = feat.shape
    C = fc_w.shape[1]
    bp, tb = _choose_batch_tiling(B)
    feat_p = _pad_batch(feat.astype(jnp.float32), bp)
    grid = bp // tb

    out = pl.pallas_call(
        _fc_logsoftmax_kernel,
        out_shape=jax.ShapeDtypeStruct((bp, C), jnp.float32),
        grid_spec=pltpu.PrefetchScalarGridSpec(
            num_scalar_prefetch=0,
            grid=(grid,),
            in_specs=[
                pl.BlockSpec((tb, F), lambda i: (i, 0)),
                pl.BlockSpec((F, C), lambda i: (0, 0)),
            ],
            out_specs=pl.BlockSpec((tb, C), lambda i: (i, 0)),
        ),
        compiler_params=pltpu.CompilerParams(
            dimension_semantics=("parallel",)),
    )(feat_p, fc_w.astype(jnp.float32))
    return out[:B]


# ----------------------------------------------------------------------------
# SVD-based SPD nonlinearities (plain JAX glue — no Pallas SVD primitive)
# ----------------------------------------------------------------------------
def _sym(x):
    return 0.5 * (x + jnp.swapaxes(x, -1, -2))


def rec_mat(x, eps=1e-4):
    """ReEig: clamp singular values of each (symmetric PSD) matrix at eps."""
    U, S, _ = jnp.linalg.svd(_sym(x))                 # batched
    S = jnp.maximum(S, eps)
    return jnp.einsum("bij,bj,bkj->bik", U, S, U)


def log_mat(x):
    """LogEig: matrix logarithm via SVD of each (symmetric PSD) matrix."""
    U, S, _ = jnp.linalg.svd(_sym(x))
    # Floor at f32 tiny: reference runs in f64; avoid log(0) -> -inf in f32.
    S = jnp.maximum(S, jnp.finfo(jnp.float32).tiny)
    return jnp.einsum("bij,bj,bkj->bik", U, jnp.log(S), U)


# ----------------------------------------------------------------------------
# SPDNetwork_1 forward
# ----------------------------------------------------------------------------
@jax.jit
def spd_network_1_forward(x, params):
    """x: (B, 19, 19) SPD matrices. Returns (log_probs (B, 2), feat (B, 16))."""
    w1, w2, w3, fc_w = params["w1"], params["w2"], params["w3"], params["fc_w"]
    B = x.shape[0]

    out = x
    for w in (w1, w2):
        out = bilinear_transform(out, w)   # Pallas: flat vec(X) @ kron(w, w)
        out = rec_mat(out)                 # ReEig (SVD, plain JAX)

    out = bilinear_transform(out, w3)      # Pallas -> (B, 4, 4)
    x3 = log_mat(out)                      # LogEig (SVD, plain JAX)

    feat = x3.reshape(B, -1)               # (B, 16)
    log_probs = fc_log_softmax(feat, fc_w)  # Pallas: matmul + log_softmax
    return log_probs, feat


def init_params(key):
    k1, k2, k3, k4 = jax.random.split(key, 4)
    return {
        "w1": jax.random.normal(k1, (19, 19), dtype=jnp.float32),
        "w2": jax.random.normal(k2, (19, 16), dtype=jnp.float32),
        "w3": jax.random.normal(k3, (16, 4), dtype=jnp.float32),
        "fc_w": jax.random.normal(k4, (16, 2), dtype=jnp.float32),
    }


if __name__ == "__main__":
    key = jax.random.PRNGKey(0)
    pkey, xkey = jax.random.split(key)

    params = init_params(pkey)

    # Build a small batch of SPD input matrices (B, 19, 19).
    B, N = 2, 19
    A = jax.random.normal(xkey, (B, N, N), dtype=jnp.float32)
    x = jnp.einsum("bij,bkj->bik", A, A) + 1e-2 * jnp.eye(N, dtype=jnp.float32)

    # --- kernel-level cross-checks against plain-JAX references -------------
    ref_bil = jnp.einsum("ip,bij,jq->bpq", params["w1"], x, params["w1"])
    got_bil = bilinear_transform(x, params["w1"])
    rel_err = jnp.max(jnp.abs(ref_bil - got_bil)) / (
        jnp.max(jnp.abs(ref_bil)) + 1e-30)
    assert float(rel_err) < 1e-4, f"bilinear kron-kernel mismatch: {rel_err}"

    # --- full forward --------------------------------------------------------
    log_probs, feat = spd_network_1_forward(x, params)
    jax.block_until_ready((log_probs, feat))

    assert log_probs.shape == (B, 2)
    assert feat.shape == (B, 16)
    assert bool(jnp.all(jnp.isfinite(log_probs)))
    assert bool(jnp.all(jnp.isfinite(feat)))

    ref_lp = jax.nn.log_softmax(feat @ params["fc_w"], axis=-1)
    assert bool(jnp.allclose(ref_lp, log_probs, atol=1e-2, rtol=1e-4)), \
        "fc+log_softmax kernel mismatch"

    print("KERNEL_OK")
</pallas_src>

<mosaic_0001>
module attributes {stable_mosaic.version = 11 : i64} {
  func.func @_flat_matmul_kernel(%arg0: i32, %arg1: memref<8x361xf32, #tpu.memory_space<vmem>>, %arg2: memref<361x361xf32, #tpu.memory_space<vmem>>, %arg3: memref<8x361xf32, #tpu.memory_space<vmem>>) attributes {dimension_semantics = [#tpu.dimension_semantics<parallel>], iteration_bounds = array<i64: 1>, scalar_prefetch = 0 : i64, scratch_operands = 0 : i64, tpu.core_type = #tpu.core_type<tc>, window_params = [{transform_indices = @transform_0, window_bounds = array<i64: 8, 361>}, {pipeline_mode = #tpu.pipeline_mode<synchronous>, transform_indices = @transform_1, window_bounds = array<i64: 361, 361>}, {transform_indices = @transform_2, window_bounds = array<i64: 8, 361>}]} {
    %c0 = arith.constant 0 : index
    %c0_0 = arith.constant 0 : index
    %0 = vector.load %arg1[%c0, %c0_0] : memref<8x361xf32, #tpu.memory_space<vmem>>, vector<8x361xf32>
    %c0_1 = arith.constant 0 : index
    %c0_2 = arith.constant 0 : index
    %1 = vector.load %arg2[%c0_1, %c0_2] : memref<361x361xf32, #tpu.memory_space<vmem>>, vector<361x361xf32>
    %cst = arith.constant dense<0.000000e+00> : vector<8x361xf32>
    %2 = tpu.matmul %0, %1, %cst {dimension_numbers = #tpu.dot_dimension_numbers<[1], [0], [0], [1], [0, 0, 1, 1], [], []>} : vector<8x361xf32>, vector<361x361xf32>, vector<8x361xf32> -> vector<8x361xf32>
    %c0_3 = arith.constant 0 : index
    %c0_4 = arith.constant 0 : index
    %3 = vector.load %arg3[%c0_3, %c0_4] : memref<8x361xf32, #tpu.memory_space<vmem>>, vector<8x361xf32>
    tpu.vector_store %arg3[%c0_3, %c0_4], %2 {strides = array<i32>} : memref<8x361xf32, #tpu.memory_space<vmem>>, vector<8x361xf32>,
    return
  }
  func.func @transform_0(%arg0: i32) -> (i32, i32) {
    %c0_i32 = arith.constant 0 : i32
    %c0_i32_0 = arith.constant 0 : i32
    return %arg0, %c0_i32 : i32, i32
  }
  func.func @transform_1(%arg0: i32) -> (i32, i32) {
    %c0_i32 = arith.constant 0 : i32
    %c0_i32_0 = arith.constant 0 : i32
    %c0_i32_1 = arith.constant 0 : i32
    return %c0_i32, %c0_i32_0 : i32, i32
  }
  func.func @transform_2(%arg0: i32) -> (i32, i32) {
    %c0_i32 = arith.constant 0 : i32
    %c0_i32_0 = arith.constant 0 : i32
    return %arg0, %c0_i32 : i32, i32
  }
}

</mosaic_0001>

<bundles_post_ra>
// kernel: tpu_custom_call.1
= control target key start
LH: loop header
LB: loop body
LE: loop exit
PB: predicated region body
PF: predicated region fallthrough
CT: control target
= control target key end

     0   :  { %7 = vsyncpa [#allocation3], 0  ;;  %s710_s0 = inlined_call_operand.hbm [shape: f32[8,361], index: 0, kind: input, shape index: {}]   ;;  %s711_s1 = inlined_call_operand.hbm [shape: f32[361,361], index: 1, kind: input, shape index: {}]   ;;  %s712_s2 = inlined_call_operand.hbm [shape: f32[8,361], index: 2, kind: output, shape index: {}]  }
   0x1   :  { %8 = vsyncpa [#allocation6], 0 }
   0x2   :  { %9 = vsyncpa [#allocation4], 0  ;;  %s653_s9 = smov [#allocation2]   ;;  %s654_s11 = smov [#allocation5]  }
   0x3   :  { %s16_s10 = sshll.u32 %s653_s9, 4  ;;  %s25_s12 = sshll.u32 %s654_s11, 4  ;;  %s17_s10 = int_to_ptr.vmem [resolvable:$true] %s16_s10  ;;  %s26_s12 = int_to_ptr.vmem [resolvable:$true] %s25_s12 }
   0x4   :  { %s595_s13 = scalar_lea.vmem %s17_s10, 384  ;;  %p600_p1 = scmp.lt.s32.totalorder %s17_s10, %s17_s10 }
   0x5   :  { %p596_p0 = scmp.ne.s32.totalorder %s17_s10, %s595_s13  ;;  %p601_p2 = scmp.lt.s32.totalorder %s595_s13, %s595_s13 }
   0x7   :  { %p602_p3 = por %p601_p2, %p600_p1 }
   0x9   :  { %p603_p4 = pnand %p602_p3, %p596_p0 }
   0xb   :  { %606 = shalt.err (!%p603_p4)
}
   0xc   :  { %19 = dma.hbm_to_vmem [thread:$0]  %s710_s0, 384, %s17_s10, [#allocation3]  }
   0xd   :  { %s615_s16 = scalar_lea.vmem %s26_s12, 17664  ;;  %p620_p6 = scmp.lt.s32.totalorder %s26_s12, %s26_s12 }
   0xe   :  { %p616_p5 = scmp.ne.s32.totalorder %s26_s12, %s615_s16  ;;  %p621_p7 = scmp.lt.s32.totalorder %s615_s16, %s615_s16 }
  0x10   :  { %p622_p8 = por %p621_p7, %p620_p6 }
  0x12   :  { %p623_p9 = pnand %p622_p8, %p616_p5 }
  0x14   :  { %626 = shalt.err (!%p623_p9)
}
  0x15   :  { %s655_s17 = smov 384   ;;  %s656_s18 = smov 24  }
  0x16   :  { %31 = dma.hbm_to_vmem [thread:$0]  %s711_s1, 17664, %s26_s12, [#allocation6], %s655_s17, %s655_s17, %s656_s18  }
  0x17   :  { %647 = dma.done.wait [#allocation3], 384  }
  0x18   :  { %648 = vsyncadd [#allocation3], 4294966912 }
  0x19   :  { %649 = dma.done.wait [#allocation6], 17664  }
  0x1a   :  { %650 = vsyncadd [#allocation6], 4294949632  ;;  %v657_v0 = vmov 0.0   ;;  %vm183_vm0 = vcmask 1040384   ;;  %v87_v1 = vld [vmem:[#allocation5 + $0x170] sm:$0xff]  ;;  %v86_v3 = vld [vmem:[#allocation5 + $0x168] sm:$0xff] }
  0x1b   :  { %328 = vmatprep.mubr.f32.mxu1 %v657_v0  ;;  %v177_v2 = vld [vmem:[#allocation5 + $0x440] sm:$0x1]  ;;  %193 = vmatprep.subr.mxu0 %v87_v1  ;;  %v176_v4 = vld [vmem:[#allocation5 + $0x438] sm:$0x1]  ;;  %v174_v6 = vld [vmem:[#allocation5 + $0x428] sm:$0xff]  ;;  %vm179_vm1 = vcmask 859136  }
  0x1c   :  { %494 = vmatprep.subr.msk.mxu1 %vm183_vm0, %v177_v2  ;;  %v84_v5 = vld [vmem:[#allocation5 + $0x158] sm:$0xff]  ;;  %194 = vmatpush1.msra.mxu0 %v86_v3  ;;  %v83_v7 = vld [vmem:[#allocation5 + $0x150] sm:$0xff]  ;;  %v173_v8 = vld [vmem:[#allocation5 + $0x420] sm:$0xff]  ;;  %vm658_vm2 = vmmov 0   ;;  %s659_s0 = smov [#allocation7]  }
  0x1d   :  { %495 = vmatpush1.msk.msra.mxu1 %vm183_vm0, %v176_v4  ;;  %v81_v9 = vld [vmem:[#allocation5 + $0x140] sm:$0xff]  ;;  %195 = vmatprep.subr.mxu0 %v84_v5  ;;  %v171_v10 = vld [vmem:[#allocation5 + $0x410] sm:$0xff]  ;;  %v80_v11 = vld [vmem:[#allocation5 + $0x138] sm:$0xff]  ;;  %s484_s1 = sshll.u32 %s659_s0, 4  ;;  %s485_s1 = int_to_ptr.vmem [resolvable:$true] %s484_s1 }
  0x1e   :  { %270 = vmatprep.subr.mxu1 %v174_v6  ;;  %v170_v12 = vld [vmem:[#allocation5 + $0x408] sm:$0xff]  ;;  %196 = vmatpush1.msra.mxu0 %v83_v7  ;;  %v168_v14 = vld [vmem:[#allocation5 + $0x3f8] sm:$0xff]  ;;  %v77_v15 = vld [vmem:[#allocation5 + $0x120] sm:$0xff]  ;;  %s627_s21 = scalar_lea.vmem %s485_s1, 384  ;;  %p632_p11 = scmp.lt.s32.totalorder %s485_s1, %s485_s1 }
  0x1f   :  { %271 = vmatpush1.msra.mxu1 %v173_v8  ;;  %v78_v13 = vld [vmem:[#allocation5 + $0x128] sm:$0xff]  ;;  %197 = vmatprep.subr.mxu0 %v81_v9  ;;  %v167_v16 = vld [vmem:[#allocation5 + $0x3f0] sm:$0xff]  ;;  %v165_v18 = vld [vmem:[#allocation5 + $0x3e0] sm:$0xff]  ;;  %p628_p10 = scmp.ne.s32.totalorder %s485_s1, %s627_s21  ;;  %p633_p12 = scmp.lt.s32.totalorder %s627_s21, %s627_s21 }
  0x20   :  { %272 = vmatprep.subr.mxu1 %v171_v10  ;;  %198 = vmatpush1.msra.mxu0 %v80_v11  ;;  %v75_v17 = vld [vmem:[#allocation5 + $0x110] sm:$0xff]  ;;  %v74_v19 = vld [vmem:[#allocation5 + $0x108] sm:$0xff]  ;;  %v164_v20 = vld [vmem:[#allocation5 + $0x3d8] sm:$0xff] }
  0x21   :  { %273 = vmatpush1.msra.mxu1 %v170_v12  ;;  %199 = vmatprep.subr.mxu0 %v78_v13  ;;  %v72_v21 = vld [vmem:[#allocation5 + $0xf8] sm:$0xff]  ;;  %v162_v22 = vld [vmem:[#allocation5 + $0x3c8] sm:$0xff]  ;;  %v71_v23 = vld [vmem:[#allocation5 + $0xf0] sm:$0xff]  ;;  %p634_p13 = por %p633_p12, %p632_p11 }
  0x22   :  { %274 = vmatprep.subr.mxu1 %v168_v14  ;;  %200 = vmatpush1.msra.mxu0 %v77_v15  ;;  %v161_v24 = vld [vmem:[#allocation5 + $0x3c0] sm:$0xff]  ;;  %v159_v26 = vld [vmem:[#allocation5 + $0x3b0] sm:$0xff]  ;;  %v68_v27 = vld [vmem:[#allocation5 + $0xd8] sm:$0xff] }
  0x23   :  { %275 = vmatpush1.msra.mxu1 %v167_v16  ;;  %201 = vmatprep.subr.mxu0 %v75_v17  ;;  %v69_v25 = vld [vmem:[#allocation5 + $0xe0] sm:$0xff]  ;;  %v158_v28 = vld [vmem:[#allocation5 + $0x3a8] sm:$0xff]  ;;  %v156_v30 = vld [vmem:[#allocation5 + $0x398] sm:$0xff]  ;;  %p635_p0 = pnand %p634_p13, %p628_p10 }
  0x24   :  { %276 = vmatprep.subr.mxu1 %v165_v18  ;;  %202 = vmatpush1.msra.mxu0 %v74_v19  ;;  %v66_v29 = vld [vmem:[#allocation5 + $0xc8] sm:$0xff]  ;;  %v65_v31 = vld [vmem:[#allocation5 + $0xc0] sm:$0xff]  ;;  %v155_v32 = vld [vmem:[#allocation5 + $0x390] sm:$0xff] }
  0x25   :  { %277 = vmatpush1.msra.mxu1 %v164_v20  ;;  %203 = vmatprep.subr.mxu0 %v72_v21  ;;  %v63_v33 = vld [vmem:[#allocation5 + $0xb0] sm:$0xff]  ;;  %v153_v34 = vld [vmem:[#allocation5 + $0x380] sm:$0xff]  ;;  %v62_v35 = vld [vmem:[#allocation5 + $0xa8] sm:$0xff] }
  0x26   :  { %278 = vmatprep.subr.mxu1 %v162_v22  ;;  %204 = vmatpush1.msra.mxu0 %v71_v23  ;;  %v152_v36 = vld [vmem:[#allocation5 + $0x378] sm:$0xff]  ;;  %v150_v38 = vld [vmem:[#allocation5 + $0x368] sm:$0xff]  ;;  %v59_v39 = vld [vmem:[#allocation5 + $0x90] sm:$0xff] }
  0x27   :  { %279 = vmatpush1.msra.mxu1 %v161_v24  ;;  %205 = vmatprep.subr.mxu0 %v69_v25  ;;  %v60_v37 = vld [vmem:[#allocation5 + $0x98] sm:$0xff]  ;;  %v149_v40 = vld [vmem:[#allocation5 + $0x360] sm:$0xff]  ;;  %v147_v42 = vld [vmem:[#allocation5 + $0x350] sm:$0xff] }
  0x28   :  { %280 = vmatprep.subr.mxu1 %v159_v26  ;;  %206 = vmatpush1.msra.mxu0 %v68_v27  ;;  %v57_v41 = vld [vmem:[#allocation5 + $0x80] sm:$0xff]  ;;  %v56_v43 = vld [vmem:[#allocation5 + $0x78] sm:$0xff]  ;;  %v146_v44 = vld [vmem:[#allocation5 + $0x348] sm:$0xff] }
  0x29   :  { %281 = vmatpush1.msra.mxu1 %v158_v28  ;;  %207 = vmatprep.subr.mxu0 %v66_v29  ;;  %v54_v45 = vld [vmem:[#allocation5 + $0x68] sm:$0xff]  ;;  %v144_v46 = vld [vmem:[#allocation5 + $0x338] sm:$0xff]  ;;  %v53_v47 = vld [vmem:[#allocation5 + $0x60] sm:$0xff] }
  0x2a   :  { %282 = vmatprep.subr.mxu1 %v156_v30  ;;  %208 = vmatpush1.msra.mxu0 %v65_v31  ;;  %v143_v48 = vld [vmem:[#allocation5 + $0x330] sm:$0xff]  ;;  %v141_v50 = vld [vmem:[#allocation5 + $0x320] sm:$0xff]  ;;  %v50_v51 = vld [vmem:[#allocation5 + $0x48] sm:$0xff] }
  0x2b   :  { %283 = vmatpush1.msra.mxu1 %v155_v32  ;;  %209 = vmatprep.subr.mxu0 %v63_v33  ;;  %v51_v49 = vld [vmem:[#allocation5 + $0x50] sm:$0xff]  ;;  %v140_v52 = vld [vmem:[#allocation5 + $0x318] sm:$0xff]  ;;  %v138_v54 = vld [vmem:[#allocation5 + $0x308] sm:$0xff] }
  0x2c   :  { %284 = vmatprep.subr.mxu1 %v153_v34  ;;  %210 = vmatpush1.msra.mxu0 %v62_v35  ;;  %v48_v53 = vld [vmem:[#allocation5 + $0x38] sm:$0xff]  ;;  %v47_v55 = vld [vmem:[#allocation5 + $0x30] sm:$0xff]  ;;  %v137_v56 = vld [vmem:[#allocation5 + $0x300] sm:$0xff] }
  0x2d   :  { %285 = vmatpush1.msra.mxu1 %v152_v36  ;;  %211 = vmatprep.subr.mxu0 %v60_v37  ;;  %v45_v57 = vld [vmem:[#allocation5 + $0x20] sm:$0xff]  ;;  %v684_v58 = vld [vmem:[#allocation2 + $0x10] sm:$0xff]  ;;  %v42_v62 = vld [vmem:[#allocation5 + $0x8] sm:$0xff] }
  0x2e   :  { %286 = vmatprep.subr.mxu1 %v150_v38  ;;  %212 = vmatpush1.msra.mxu0 %v59_v39  ;;  %v136_v59 = vld [vmem:[#allocation5 + $0x2f8] sm:$0xff]  ;;  %v133_v63 = vld [vmem:[#allocation5 + $0x2e0] sm:$0xff]  ;;  %v135_v3 = vld [vmem:[#allocation5 + $0x2f0] sm:$0xff] }
  0x2f   :  { %287 = vmatpush1.msra.mxu1 %v149_v40  ;;  %213 = vmatprep.subr.mxu0 %v57_v41  ;;  %v44_v60 = vld [vmem:[#allocation5 + $0x18] sm:$0xff]  ;;  %v41_v1 = vld [vmem:[#allocation5] sm:$0xff]  ;;  %v130_v4 = vld [vmem:[#allocation5 + $0x2c8] sm:$0xff] }
  0x30   :  { %288 = vmatprep.subr.mxu1 %v147_v42  ;;  %214 = vmatpush1.msra.mxu0 %v56_v43  ;;  %v88_v61 = vld [vmem:[#allocation5 + $0x178] sm:$0xff]  ;;  %v85_v2 = vld [vmem:[#allocation5 + $0x160] sm:$0xff]  ;;  %v134_v5 = vld [vmem:[#allocation5 + $0x2e8] sm:$0xff] }
  0x31   :  { %289 = vmatpush1.msra.mxu1 %v146_v44  ;;  %215 = vmatprep.subr.mxu0 %v54_v45  ;;  %v82_v6 = vld [vmem:[#allocation5 + $0x148] sm:$0xff]  ;;  %v132_v7 = vld [vmem:[#allocation5 + $0x2d8] sm:$0xff]  ;;  %v127_v8 = vld [vmem:[#allocation5 + $0x2b0] sm:$0xff] }
  0x32   :  { %290 = vmatprep.subr.mxu1 %v144_v46  ;;  %216 = vmatpush1.msra.mxu0 %v53_v47  ;;  %v131_v9 = vld [vmem:[#allocation5 + $0x2d0] sm:$0xff]  ;;  %v129_v11 = vld [vmem:[#allocation5 + $0x2c0] sm:$0xff]  ;;  %v124_v12 = vld [vmem:[#allocation5 + $0x298] sm:$0xff] }
  0x33   :  { %291 = vmatpush1.msra.mxu1 %v143_v48  ;;  %217 = vmatprep.subr.mxu0 %v51_v49  ;;  %v79_v10 = vld [vmem:[#allocation5 + $0x130] sm:$0xff]  ;;  %v128_v13 = vld [vmem:[#allocation5 + $0x2b8] sm:$0xff]  ;;  %v126_v15 = vld [vmem:[#allocation5 + $0x2a8] sm:$0xff] }
  0x34   :  { %292 = vmatprep.subr.mxu1 %v141_v50  ;;  %218 = vmatpush1.msra.mxu0 %v50_v51  ;;  %v76_v14 = vld [vmem:[#allocation5 + $0x118] sm:$0xff]  ;;  %v121_v16 = vld [vmem:[#allocation5 + $0x280] sm:$0xff]  ;;  %v123_v19 = vld [vmem:[#allocation5 + $0x290] sm:$0xff] }
  0x35   :  { %293 = vmatpush1.msra.mxu1 %v140_v52  ;;  %219 = vmatprep.subr.mxu0 %v48_v53  ;;  %v125_v17 = vld [vmem:[#allocation5 + $0x2a0] sm:$0xff]  ;;  %v118_v20 = vld [vmem:[#allocation5 + $0x268] sm:$0xff]  ;;  %v120_v23 = vld [vmem:[#allocation5 + $0x278] sm:$0xff] }
  0x36   :  { %294 = vmatprep.subr.mxu1 %v138_v54  ;;  %220 = vmatpush1.msra.mxu0 %v47_v55  ;;  %v73_v18 = vld [vmem:[#allocation5 + $0x100] sm:$0xff]  ;;  %v122_v21 = vld [vmem:[#allocation5 + $0x288] sm:$0xff]  ;;  %v115_v24 = vld [vmem:[#allocation5 + $0x250] sm:$0xff] }
  0x37   :  { %295 = vmatpush1.msra.mxu1 %v137_v56  ;;  %221 = vmatprep.subr.mxu0 %v45_v57  ;;  %v70_v22 = vld [vmem:[#allocation5 + $0xe8] sm:$0xff]  ;;  %v119_v25 = vld [vmem:[#allocation5 + $0x270] sm:$0xff]  ;;  %v117_v27 = vld [vmem:[#allocation5 + $0x260] sm:$0xff] }
  0x38   :  { %496 = vmatmul.mubr.msk.f32.vlgmr.msra.gmra.mxu1 %vm179_vm1, %v684_v58  ;;  %499 = vmatprep.subr.mxu1 %v136_v59  ;;  %v67_v26 = vld [vmem:[#allocation5 + $0xd0] sm:$0xff]  ;;  %v112_v28 = vld [vmem:[#allocation5 + $0x238] sm:$0xff]  ;;  %v114_v31 = vld [vmem:[#allocation5 + $0x248] sm:$0xff] }
  0x39   :  { %222 = vmatpush1.msra.mxu0 %v44_v60  ;;  %500 = vmatpush3.msra.mxu1 %v88_v61  ;;  %v116_v29 = vld [vmem:[#allocation5 + $0x258] sm:$0xff]  ;;  %v109_v32 = vld [vmem:[#allocation5 + $0x220] sm:$0xff]  ;;  %v111_v35 = vld [vmem:[#allocation5 + $0x230] sm:$0xff] }
  0x3a   :  { %223 = vmatprep.subr.mxu0 %v42_v62  ;;  %501 = vmatprep.subr.mxu1 %v133_v63  ;;  %v64_v30 = vld [vmem:[#allocation5 + $0xb8] sm:$0xff]  ;;  %v113_v33 = vld [vmem:[#allocation5 + $0x240] sm:$0xff]  ;;  %v106_v36 = vld [vmem:[#allocation5 + $0x208] sm:$0xff] }
  0x3b   :  { %224 = vmatpush1.msra.mxu0 %v41_v1  ;;  %502 = vmatpush3.msra.mxu1 %v85_v2  ;;  %v61_v34 = vld [vmem:[#allocation5 + $0xa0] sm:$0xff]  ;;  %v110_v37 = vld [vmem:[#allocation5 + $0x228] sm:$0xff]  ;;  %v108_v39 = vld [vmem:[#allocation5 + $0x218] sm:$0xff] }
  0x3c   :  { %225 = vmatprep.subr.mxu0 %v135_v3  ;;  %503 = vmatprep.subr.mxu1 %v130_v4  ;;  %v58_v38 = vld [vmem:[#allocation5 + $0x88] sm:$0xff]  ;;  %v103_v40 = vld [vmem:[#allocation5 + $0x1f0] sm:$0xff]  ;;  %v105_v43 = vld [vmem:[#allocation5 + $0x200] sm:$0xff] }
  0x3d   :  { %226 = vmatpush2.msra.mxu0 %v134_v5  ;;  %504 = vmatpush3.msra.mxu1 %v82_v6  ;;  %v107_v41 = vld [vmem:[#allocation5 + $0x210] sm:$0xff]  ;;  %v100_v44 = vld [vmem:[#allocation5 + $0x1d8] sm:$0xff]  ;;  %v102_v47 = vld [vmem:[#allocation5 + $0x1e8] sm:$0xff] }
  0x3e   :  { %227 = vmatprep.subr.mxu0 %v132_v7  ;;  %505 = vmatprep.subr.mxu1 %v127_v8  ;;  %v55_v42 = vld [vmem:[#allocation5 + $0x70] sm:$0xff]  ;;  %v104_v45 = vld [vmem:[#allocation5 + $0x1f8] sm:$0xff]  ;;  %v97_v48 = vld [vmem:[#allocation5 + $0x1c0] sm:$0xff] }
  0x3f   :  { %228 = vmatpush2.msra.mxu0 %v131_v9  ;;  %506 = vmatpush3.msra.mxu1 %v79_v10  ;;  %v52_v46 = vld [vmem:[#allocation5 + $0x58] sm:$0xff]  ;;  %v101_v49 = vld [vmem:[#allocation5 + $0x1e0] sm:$0xff]  ;;  %v99_v51 = vld [vmem:[#allocation5 + $0x1d0] sm:$0xff] }
  0x40   :  { %229 = vmatprep.subr.mxu0 %v129_v11  ;;  %507 = vmatprep.subr.mxu1 %v124_v12  ;;  %v49_v50 = vld [vmem:[#allocation5 + $0x40] sm:$0xff]  ;;  %v94_v52 = vld [vmem:[#allocation5 + $0x1a8] sm:$0xff]  ;;  %v96_v55 = vld [vmem:[#allocation5 + $0x1b8] sm:$0xff] }
  0x41   :  { %230 = vmatpush2.msra.mxu0 %v128_v13  ;;  %508 = vmatpush3.msra.mxu1 %v76_v14  ;;  %v98_v53 = vld [vmem:[#allocation5 + $0x1c8] sm:$0xff]  ;;  %v91_v56 = vld [vmem:[#allocation5 + $0x190] sm:$0xff]  ;;  %v93_v61 = vld [vmem:[#allocation5 + $0x1a0] sm:$0xff] }
  0x42   :  { %231 = vmatprep.subr.mxu0 %v126_v15  ;;  %509 = vmatprep.subr.mxu1 %v121_v16  ;;  %v46_v54 = vld [vmem:[#allocation5 + $0x28] sm:$0xff]  ;;  %v95_v57 = vld [vmem:[#allocation5 + $0x1b0] sm:$0xff]  ;;  %v92_v63 = vld [vmem:[#allocation5 + $0x198] sm:$0xff] }
  0x43   :  { %232 = vmatpush2.msra.mxu0 %v125_v17  ;;  %510 = vmatpush3.msra.mxu1 %v73_v18  ;;  %v43_v59 = vld [vmem:[#allocation5 + $0x10] sm:$0xff]  ;;  %v38_v62 = vld [vmem:[#allocation2] sm:$0xff]  ;;  %v89_v3 = vld [vmem:[#allocation5 + $0x180] sm:$0xff] }
  0x44   :  { %233 = vmatprep.subr.mxu0 %v123_v19  ;;  %511 = vmatprep.subr.mxu1 %v118_v20  ;;  %v39_v60 = vld [vmem:[#allocation2 + $0x8] sm:$0xff]  ;;  %v178_v1 = vld [vmem:[#allocation5 + $0x448] sm:$0x1]  ;;  %v172_v5 = vld [vmem:[#allocation5 + $0x418] sm:$0xff] }
  0x45   :  { %234 = vmatpush2.msra.mxu0 %v122_v21  ;;  %512 = vmatpush3.msra.mxu1 %v70_v22  ;;  %v90_v2 = vld [vmem:[#allocation5 + $0x188] sm:$0xff]  ;;  %v175_v4 = vld [vmem:[#allocation5 + $0x430] sm:$0xff]  ;;  %v169_v6 = vld [vmem:[#allocation5 + $0x400] sm:$0xff] }
  0x46   :  { %235 = vmatprep.subr.mxu0 %v120_v23  ;;  %513 = vmatprep.subr.mxu1 %v115_v24  ;;  %v166_v7 = vld [vmem:[#allocation5 + $0x3e8] sm:$0xff]  ;;  %v163_v8 = vld [vmem:[#allocation5 + $0x3d0] sm:$0xff]  ;;  %v160_v9 = vld [vmem:[#allocation5 + $0x3b8] sm:$0xff] }
  0x47   :  { %236 = vmatpush2.msra.mxu0 %v119_v25  ;;  %514 = vmatpush3.msra.mxu1 %v67_v26  ;;  %v157_v10 = vld [vmem:[#allocation5 + $0x3a0] sm:$0xff]  ;;  %v154_v11 = vld [vmem:[#allocation5 + $0x388] sm:$0xff]  ;;  %v151_v12 = vld [vmem:[#allocation5 + $0x370] sm:$0xff] }
  0x48   :  { %237 = vmatprep.subr.mxu0 %v117_v27  ;;  %515 = vmatprep.subr.mxu1 %v112_v28  ;;  %v148_v13 = vld [vmem:[#allocation5 + $0x358] sm:$0xff]  ;;  %v145_v14 = vld [vmem:[#allocation5 + $0x340] sm:$0xff]  ;;  %v142_v15 = vld [vmem:[#allocation5 + $0x328] sm:$0xff] }
  0x49   :  { %238 = vmatpush2.msra.mxu0 %v116_v29  ;;  %516 = vmatpush3.msra.mxu1 %v64_v30  ;;  %v139_v16 = vld [vmem:[#allocation5 + $0x310] sm:$0xff] }
  0x4a   :  { %239 = vmatprep.subr.mxu0 %v114_v31  ;;  %517 = vmatprep.subr.mxu1 %v109_v32 }
  0x4b   :  { %240 = vmatpush2.msra.mxu0 %v113_v33  ;;  %518 = vmatpush3.msra.mxu1 %v61_v34 }
  0x4c   :  { %241 = vmatprep.subr.mxu0 %v111_v35  ;;  %519 = vmatprep.subr.mxu1 %v106_v36 }
  0x4d   :  { %242 = vmatpush2.msra.mxu0 %v110_v37  ;;  %520 = vmatpush3.msra.mxu1 %v58_v38 }
  0x4e   :  { %243 = vmatprep.subr.mxu0 %v108_v39  ;;  %521 = vmatprep.subr.mxu1 %v103_v40 }
  0x4f   :  { %244 = vmatpush2.msra.mxu0 %v107_v41  ;;  %522 = vmatpush3.msra.mxu1 %v55_v42 }
  0x50   :  { %245 = vmatprep.subr.mxu0 %v105_v43  ;;  %523 = vmatprep.subr.mxu1 %v100_v44 }
  0x51   :  { %246 = vmatpush2.msra.mxu0 %v104_v45  ;;  %524 = vmatpush3.msra.mxu1 %v52_v46 }
  0x52   :  { %247 = vmatprep.subr.mxu0 %v102_v47  ;;  %525 = vmatprep.subr.mxu1 %v97_v48 }
  0x53   :  { %248 = vmatpush2.msra.mxu0 %v101_v49  ;;  %526 = vmatpush3.msra.mxu1 %v49_v50 }
  0x54   :  { %249 = vmatprep.subr.mxu0 %v99_v51  ;;  %527 = vmatprep.subr.mxu1 %v94_v52 }
  0x55   :  { %250 = vmatpush2.msra.mxu0 %v98_v53  ;;  %528 = vmatpush3.msra.mxu1 %v46_v54 }
  0x56   :  { %251 = vmatprep.subr.mxu0 %v96_v55  ;;  %529 = vmatprep.subr.mxu1 %v91_v56 }
  0x57   :  { %252 = vmatpush2.msra.mxu0 %v95_v57  ;;  %530 = vmatpush3.msra.mxu1 %v43_v59 }
  0x58   :  { %399 = vmatprep.mubr.f32.mxu1 %v39_v60  ;;  %253 = vmatprep.subr.mxu0 %v93_v61 }
  0x59   :  { %400 = vmatmul.mubr.f32.vlgmr.msra.gmra.mxu1 %v38_v62  ;;  %549 = vmatprep.subr.mxu1 %v657_v0 }
  0x5a   :  { %254 = vmatpush2.msra.mxu0 %v92_v63  ;;  %550 = vmatpush3.msk.msra.mxu1 %vm183_vm0, %v178_v1 }
  0x5b   :  { %255 = vmatprep.subr.mxu0 %v90_v2  ;;  %551 = vmatprep.subr.mxu1 %v657_v0 }
  0x5c   :  { %256 = vmatpush2.msra.mxu0 %v89_v3  ;;  %257 = vmatprep.mubr.f32.mxu0 %v39_v60 }
  0x5d   :  { %552 = vmatpush3.msra.mxu1 %v175_v4  ;;  %258 = vmatmul.mubr.f32.vlgmr.msra.gmra.mxu0 %v38_v62 }
  0x5e   :  { %553 = vmatprep.subr.mxu1 %v657_v0  ;;  %577 = vmatprep.mubr.msk.f32.mxu1 %vm658_vm2, %v657_v0 }
  0x5f   :  { %554 = vmatpush3.msra.mxu1 %v172_v5 }
  0x60   :  { %555 = vmatprep.subr.mxu1 %v657_v0 }
  0x61   :  { %556 = vmatpush3.msra.mxu1 %v169_v6 }
  0x62   :  { %557 = vmatprep.subr.mxu1 %v657_v0 }
  0x63   :  { %558 = vmatpush3.msra.mxu1 %v166_v7 }
  0x64   :  { %559 = vmatprep.subr.mxu1 %v657_v0 }
  0x65   :  { %560 = vmatpush3.msra.mxu1 %v163_v8 }
  0x66   :  { %561 = vmatprep.subr.mxu1 %v657_v0 }
  0x67   :  { %562 = vmatpush3.msra.mxu1 %v160_v9 }
  0x68   :  { %563 = vmatprep.subr.mxu1 %v657_v0 }
  0x69   :  { %564 = vmatpush3.msra.mxu1 %v157_v10 }
  0x6a   :  { %565 = vmatprep.subr.mxu1 %v657_v0 }
  0x6b   :  { %566 = vmatpush3.msra.mxu1 %v154_v11 }
  0x6c   :  { %567 = vmatprep.subr.mxu1 %v657_v0 }
  0x6d   :  { %568 = vmatpush3.msra.mxu1 %v151_v12 }
  0x6e   :  { %569 = vmatprep.subr.mxu1 %v657_v0 }
  0x6f   :  { %570 = vmatpush3.msra.mxu1 %v148_v13 }
  0x70   :  { %571 = vmatprep.subr.mxu1 %v657_v0 }
  0x71   :  { %572 = vmatpush3.msra.mxu1 %v145_v14 }
  0x72   :  { %573 = vmatprep.subr.mxu1 %v657_v0 }
  0x73   :  { %574 = vmatpush3.msra.mxu1 %v142_v15 }
  0x74   :  { %575 = vmatprep.subr.mxu1 %v657_v0 }
  0x75   :  { %576 = vmatpush3.msra.mxu1 %v139_v16 }
  0x76   :  { %578 = vmatmul.mubr.msk.f32.vlgmr.msra.gmra.mxu1 %vm179_vm1, %v684_v58 }
  0xf8   :  { %v330_v17 = vpop.f32.mrf.mxu1 }
  0xfa   :  { %v332_v20 = vpop.f32.mrf.mxu1 }
 0x119   :  { %v531_v23 = vpop.f32.mrf.mxu1 }
 0x11b   :  { %v532_v24 = vpop.f32.mrf.mxu1 }
 0x11c   :  { %v533_v25 = vadd.f32 %v532_v24, %v531_v23 }
 0x11d   :  { %v259_v18 = vpop.f32.mrf.mxu0 }
 0x11e   :  { %v331_v19 = vadd.f32 %v330_v17, %v259_v18 }
 0x11f   :  { %v261_v21 = vpop.f32.mrf.mxu0 }
 0x120   :  { %475 = vst [vmem:[#allocation7] sm:$0xff] %v331_v19  ;;  %v333_v22 = vadd.f32 %v332_v20, %v261_v21 }
 0x122   :  { %476 = vst [vmem:[#allocation7 + $0x8] sm:$0xff] %v333_v22 }
 0x136   :  { %v471_v26 = vpop.f32.mrf.mxu1 }
 0x137   :  { %v472_v27 = vadd.f32 %v533_v25, %v471_v26 }
 0x138   :  { %v579_v0 = vpop.f32.mrf.mxu1 }
 0x139   :  { %477 = vst.msk [vmem:[#allocation7 + $0x10] sm:$0xff] %vm179_vm1, %v472_v27 }
 0x13a   :  { %638 = shalt.err (!%p635_p0)
}
 0x13b   :  { %487 = dma.vmem_to_hbm [thread:$0]  %s485_s1, 384, %s712_s2, [#allocation4]  }
 0x13c   :  { %651 = dma.done.wait [#allocation4], 384  }
 0x13d   :  { %652 = vsyncadd [#allocation4], 4294966912 }
 0x13e   :  { %491 = vsyncpa [#allocation3], 1 }
 0x13f   :  { %492 = vsyncpa [#allocation6], 1 }
 0x140   :  { %493 = vsyncpa [#allocation4], 1 }

</bundles_post_ra>
